<compile_context>
chip_gen: v5e
topology: v5e:2x2
jax: 0.10.0
libtpu: 0.0.40
codegen_flags: <defaults>
</compile_context>

<pallas_src>
import jax
import jax.numpy as jnp
from jax.experimental import pallas as pl
from jax.experimental.pallas import tpu as pltpu


def _v_loss_kernel(t_sm, x0_ref, eps_ref, w_ref, bias_ref, out_ref):
    """One (batch b, lane-tile j) block.

    t_sm     : SMEM (B,)  f32   per-sample diffusion time
    x0_ref   : VMEM (C, TN)     input dtype (batch dim squeezed)
    eps_ref  : VMEM (C, TN)     input dtype
    w_ref    : VMEM (C, C) f32  1x1-conv weight   (resident, constant index_map)
    bias_ref : VMEM (C, 1) f32  1x1-conv bias     (resident, constant index_map)
    out_ref  : VMEM (n_j, TN) f32  per-batch partial-sum block, resident across
                                   the j axis; row j written at step j.
    """
    b = pl.program_id(0)
    j = pl.program_id(1)

    # sched surrogate: alpha(t) = 1 - t, sigma(t) = t   (scalar from SMEM)
    t = t_sm[b]
    alpha = 1.0 - t
    sigma = t

    # Cast up right after load: x0/eps may be streamed as bf16 at real sizes
    # to halve HBM traffic; all math stays in f32 (v5e has no bf16 VALU).
    x0 = x0_ref[...].astype(jnp.float32)      # (C, TN)
    eps = eps_ref[...].astype(jnp.float32)    # (C, TN)

    z = alpha * x0 + sigma * eps               # (C, TN)
    v = alpha * eps - sigma * x0               # (C, TN)

    # param.v surrogate (1x1 conv over channels) on the MXU: contraction only
    # over C because the block is laid out channels-major.
    # TODO(synk): param.v is an injected network in the original module; a
    # deterministic 1x1-conv surrogate is used here.
    v_hat = jnp.dot(w_ref[...], z, preferred_element_type=jnp.float32)
    v_hat = v_hat + bias_ref[...]              # (C,1) lane-broadcast

    diff = v - v_hat
    # Lane-dense partial: reduce only the small channel (sublane) axis here;
    # the cross-lane reduction happens once in the wrapper.
    part = jnp.sum(diff * diff, axis=0, keepdims=True)   # (1, TN)
    out_ref[pl.ds(j, 1), :] = part


def v_loss(x0_nchw, t, eps_nchw, W, bias, *, lane_tile=None):
    """Wrapper: layout plumbing + pallas_call + final reduction."""
    B, C, H, Wd = x0_nchw.shape
    HW = H * Wd

    # Lane-tile choice: >=512 lanes at real sizes for HBM roofline; must keep
    # the double-buffered (C, tile) input pair under the per-gen scoped VMEM
    # default (16 MiB v5e / 32 MiB v6e & v7x) — tiny here.
    if lane_tile is None:
        lane_tile = 512 if HW % 512 == 0 else HW
    assert HW % lane_tile == 0
    assert lane_tile % 128 == 0 or lane_tile == HW
    n_j = HW // lane_tile

    # Channels-major layout per sample so the conv contraction is only over C.
    x0 = x0_nchw.reshape(B, C, HW)
    eps = eps_nchw.reshape(B, C, HW)
    # TODO(synk): at real activation sizes pass x0/eps as bf16 (the kernel
    # casts up after load) to halve HBM bytes; kept f32 here for exact parity.

    w = W.astype(jnp.float32)                          # (C, C)
    bias_col = bias.reshape(C, 1).astype(jnp.float32)  # (C, 1)
    t32 = t.astype(jnp.float32)                        # (B,)

    partials = pl.pallas_call(
        _v_loss_kernel,
        out_shape=jax.ShapeDtypeStruct((B, n_j, lane_tile), jnp.float32),
        grid=(B, n_j),
        in_specs=[
            # t: whole (B,) vector in SMEM; alpha/sigma computed in-kernel.
            pl.BlockSpec(memory_space=pltpu.MemorySpace.SMEM),
            # x0 / eps: (C, lane_tile) blocks, batch dim squeezed.
            pl.BlockSpec((None, C, lane_tile), lambda b, j: (b, 0, j)),
            pl.BlockSpec((None, C, lane_tile), lambda b, j: (b, 0, j)),
            # W and bias: constant index_map -> resident across all steps.
            pl.BlockSpec((C, C), lambda b, j: (0, 0)),
            pl.BlockSpec((C, 1), lambda b, j: (0, 0)),
        ],
        # Per-batch output block resident across the j axis; each step writes
        # its own lane-dense (1, lane_tile) row -> no masked scalar stores.
        out_specs=pl.BlockSpec((None, n_j, lane_tile), lambda b, j: (b, 0, 0)),
        compiler_params=pltpu.CompilerParams(
            dimension_semantics=("parallel", "arbitrary")),
    )(t32, x0, eps, w, bias_col)

    # Final cross-lane reduction + normalization.  mean-of-per-sample-means
    # equals the global mean because every sample has the same C*H*W count.
    return jnp.sum(partials) * (1.0 / float(B * C * H * Wd))


def v_loss_reference(x0, t, eps, W, bias):
    """Pure-JAX reference matching V.forward (with the same surrogates)."""
    a = (1.0 - t)[:, None, None, None]
    s = t[:, None, None, None]
    z = a * x0 + s * eps
    B, C, H, Wd = x0.shape
    z_f = z.reshape(B, C, H * Wd)
    v_hat = jnp.einsum("ck,bkp->bcp", W, z_f) + bias.reshape(1, C, 1)
    v = (a * eps - s * x0).reshape(B, C, H * Wd)
    err = (v - v_hat) ** 2
    per_sample = err.reshape(B, -1).mean(axis=1)   # l2_error
    return per_sample.mean()


if __name__ == "__main__":
    key = jax.random.PRNGKey(0)
    k_x0, k_eps, k_t, k_w, k_b = jax.random.split(key, 5)

    B, C, H, Wd = 2, 4, 16, 16
    x0 = jax.random.normal(k_x0, (B, C, H, Wd), dtype=jnp.float32)
    # TODO(synk): torch.randn is drawn inside forward(); eps is generated
    # host-side here (in-kernel pltpu PRNG would break host-RNG parity).
    eps = jax.random.normal(k_eps, (B, C, H, Wd), dtype=jnp.float32)
    t = jax.random.uniform(k_t, (B,), dtype=jnp.float32)

    # Deterministic parameters of the param.v surrogate (1x1 conv).
    W = 0.1 * jax.random.normal(k_w, (C, C), dtype=jnp.float32)
    bias = 0.1 * jax.random.normal(k_b, (C,), dtype=jnp.float32)

    # lane_tile=128 exercises the full 2-D (batch, lane-tile) grid at the toy
    # spatial size; real sizes use the >=512-lane default.
    loss = v_loss(x0, t, eps, W, bias, lane_tile=128)
    loss = jax.block_until_ready(loss)

    ref = v_loss_reference(x0, t, eps, W, bias)
    assert jnp.allclose(loss, ref, rtol=1e-4, atol=1e-5), (loss, ref)

    print("KERNEL_OK")
</pallas_src>

<mosaic_0001>
module attributes {stable_mosaic.version = 11 : i64} {
  func.func @_v_loss_kernel(%arg0: i32, %arg1: i32, %arg2: memref<2xf32, #tpu.memory_space<smem>>, %arg3: memref<1x4x128xf32, #tpu.memory_space<vmem>>, %arg4: memref<1x4x128xf32, #tpu.memory_space<vmem>>, %arg5: memref<4x4xf32, #tpu.memory_space<vmem>>, %arg6: memref<4x1xf32, #tpu.memory_space<vmem>>, %arg7: memref<1x2x128xf32, #tpu.memory_space<vmem>>) attributes {dimension_semantics = [#tpu.dimension_semantics<parallel>, #tpu.dimension_semantics<arbitrary>], iteration_bounds = array<i64: 2, 2>, scalar_prefetch = 0 : i64, scratch_operands = 0 : i64, tpu.core_type = #tpu.core_type<tc>, window_params = [{transform_indices = @transform_0, window_bounds = array<i64: 2>}, {transform_indices = @transform_1, window_bounds = array<i64: 1, 4, 128>}, {transform_indices = @transform_2, window_bounds = array<i64: 1, 4, 128>}, {pipeline_mode = #tpu.pipeline_mode<synchronous>, transform_indices = @transform_3, window_bounds = array<i64: 4, 4>}, {pipeline_mode = #tpu.pipeline_mode<synchronous>, transform_indices = @transform_4, window_bounds = array<i64: 4, 1>}, {transform_indices = @transform_5, window_bounds = array<i64: 1, 2, 128>}]} {
    %0 = arith.index_cast %arg0 : i32 to index
    %1 = memref.load %arg2[%0] : memref<2xf32, #tpu.memory_space<smem>>
    %cst = arith.constant 1.000000e+00 : f32
    %2 = arith.subf %cst, %1 : f32
    %c0 = arith.constant 0 : index
    %c0_0 = arith.constant 0 : index
    %c0_1 = arith.constant 0 : index
    %3 = vector.load %arg3[%c0, %c0_0, %c0_1] : memref<1x4x128xf32, #tpu.memory_space<vmem>>, vector<1x4x128xf32>
    %4 = vector.shape_cast %3 : vector<1x4x128xf32> to vector<4x128xf32>
    %c0_2 = arith.constant 0 : index
    %c0_3 = arith.constant 0 : index
    %c0_4 = arith.constant 0 : index
    %5 = vector.load %arg4[%c0_2, %c0_3, %c0_4] : memref<1x4x128xf32, #tpu.memory_space<vmem>>, vector<1x4x128xf32>
    %6 = vector.shape_cast %5 : vector<1x4x128xf32> to vector<4x128xf32>
    %7 = vector.broadcast %2 : f32 to vector<4x128xf32>
    %8 = arith.mulf %7, %4 : vector<4x128xf32>
    %9 = vector.broadcast %1 : f32 to vector<4x128xf32>
    %10 = arith.mulf %9, %6 : vector<4x128xf32>
    %11 = arith.addf %8, %10 : vector<4x128xf32>
    %12 = vector.broadcast %2 : f32 to vector<4x128xf32>
    %13 = arith.mulf %12, %6 : vector<4x128xf32>
    %14 = vector.broadcast %1 : f32 to vector<4x128xf32>
    %15 = arith.mulf %14, %4 : vector<4x128xf32>
    %16 = arith.subf %13, %15 : vector<4x128xf32>
    %c0_5 = arith.constant 0 : index
    %c0_6 = arith.constant 0 : index
    %17 = vector.load %arg5[%c0_5, %c0_6] : memref<4x4xf32, #tpu.memory_space<vmem>>, vector<4x4xf32>
    %cst_7 = arith.constant dense<0.000000e+00> : vector<4x128xf32>
    %18 = tpu.matmul %17, %11, %cst_7 {dimension_numbers = #tpu.dot_dimension_numbers<[1], [0], [0], [1], [0, 0, 1, 1], [], []>} : vector<4x4xf32>, vector<4x128xf32>, vector<4x128xf32> -> vector<4x128xf32>
    %c0_8 = arith.constant 0 : index
    %c0_9 = arith.constant 0 : index
    %19 = vector.load %arg6[%c0_8, %c0_9] : memref<4x1xf32, #tpu.memory_space<vmem>>, vector<4x1xf32>
    %20 = vector.broadcast %19 : vector<4x1xf32> to vector<4x128xf32>
    %21 = arith.addf %18, %20 : vector<4x128xf32>
    %22 = arith.subf %16, %21 : vector<4x128xf32>
    %23 = arith.mulf %22, %22 : vector<4x128xf32>
    %cst_10 = arith.constant dense<0.000000e+00> : vector<128xf32>
    %24 = vector.multi_reduction <add>, %23, %cst_10 [0] : vector<4x128xf32> to vector<128xf32>
    %25 = vector.shape_cast %24 : vector<128xf32> to vector<1x128xf32>
    %c0_11 = arith.constant 0 : index
    %26 = arith.index_cast %arg1 : i32 to index
    %c0_12 = arith.constant 0 : index
    %27 = vector.load %arg7[%c0_11, %26, %c0_12] : memref<1x2x128xf32, #tpu.memory_space<vmem>>, vector<1x1x128xf32>
    %28 = vector.shape_cast %27 : vector<1x1x128xf32> to vector<1x128xf32>
    %29 = vector.shape_cast %25 : vector<1x128xf32> to vector<1x1x128xf32>
    tpu.vector_store %arg7[%c0_11, %26, %c0_12], %29 {strides = array<i32>} : memref<1x2x128xf32, #tpu.memory_space<vmem>>, vector<1x1x128xf32>,
    return
  }
  func.func @transform_0(%arg0: i32, %arg1: i32) -> i32 {
    %c0_i32 = arith.constant 0 : i32
    %c0_i32_0 = arith.constant 0 : i32
    return %c0_i32 : i32
  }
  func.func @transform_1(%arg0: i32, %arg1: i32) -> (i32, i32, i32) {
    %c0_i32 = arith.constant 0 : i32
    %c0_i32_0 = arith.constant 0 : i32
    return %arg0, %c0_i32, %arg1 : i32, i32, i32
  }
  func.func @transform_2(%arg0: i32, %arg1: i32) -> (i32, i32, i32) {
    %c0_i32 = arith.constant 0 : i32
    %c0_i32_0 = arith.constant 0 : i32
    return %arg0, %c0_i32, %arg1 : i32, i32, i32
  }
  func.func @transform_3(%arg0: i32, %arg1: i32) -> (i32, i32) {
    %c0_i32 = arith.constant 0 : i32
    %c0_i32_0 = arith.constant 0 : i32
    %c0_i32_1 = arith.constant 0 : i32
    return %c0_i32, %c0_i32_0 : i32, i32
  }
  func.func @transform_4(%arg0: i32, %arg1: i32) -> (i32, i32) {
    %c0_i32 = arith.constant 0 : i32
    %c0_i32_0 = arith.constant 0 : i32
    %c0_i32_1 = arith.constant 0 : i32
    return %c0_i32, %c0_i32_0 : i32, i32
  }
  func.func @transform_5(%arg0: i32, %arg1: i32) -> (i32, i32, i32) {
    %c0_i32 = arith.constant 0 : i32
    %c0_i32_0 = arith.constant 0 : i32
    %c0_i32_1 = arith.constant 0 : i32
    return %arg0, %c0_i32, %c0_i32_0 : i32, i32, i32
  }
}

</mosaic_0001>

<bundles_post_ra>
// kernel: tpu_custom_call.1
= control target key start
LH: loop header
LB: loop body
LE: loop exit
PB: predicated region body
PF: predicated region fallthrough
CT: control target
= control target key end

     0   :  { %s1104_s0 = inlined_call_operand.vmem [shape: f32[2], index: 0, kind: input, shape index: {}]   ;;  %s1105_s1 = inlined_call_operand.hbm [shape: f32[2,4,256], index: 1, kind: input, shape index: {}]   ;;  %s1106_s2 = inlined_call_operand.hbm [shape: f32[2,4,256], index: 2, kind: input, shape index: {}]   ;;  %s1107_s3 = inlined_call_operand.vmem [shape: f32[4,4], index: 3, kind: input, shape index: {}]   ;;  %s1108_s4 = inlined_call_operand.vmem [shape: f32[4,1], index: 4, kind: input, shape index: {}]   ;;  %s1109_s5 = inlined_call_operand.hbm [shape: f32[2,2,128], index: 5, kind: output, shape index: {}]  }
   0x1   :  { %1119 = sst [smem:[#allocation22_spill]] %s1104_s0 }
   0x2   :  { %1120 = sst [smem:[#allocation23_spill]] %s1107_s3 }
   0x3   :  { %1121 = sst [smem:[#allocation24_spill]] %s1109_s5 }
   0x4   :  { %10 = vsyncpa [#allocation5], 0 }
   0x5   :  { %11 = vsyncpa [#allocation3], 0 }
   0x6   :  { %13 = vsyncpa [#allocation3 + $0x1], 0 }
   0x7   :  { %14 = vsyncpa [#allocation8], 0 }
   0x8   :  { %16 = vsyncpa [#allocation8 + $0x1], 0 }
   0x9   :  { %17 = vsyncpa [#allocation4], 0 }
   0xa   :  { %19 = vsyncpa [#allocation4 + $0x1], 0  ;;  %s891_s18 = smov 0   ;;  %s893_s19 = smov 0  }
   0xb   :  { %s895_s20 = smov 0   ;;  %s897_s21 = smov 0  }
   0xc   :  { %s899_s22 = smov 0   ;;  %s901_s23 = smov 0  }
   0xd   :  { %s903_s24 = smov 0   ;;  %s905_s25 = smov 0  }
   0xe   :  { %s907_s26 = smov 0   ;;  %s909_s27 = smov 0  }
   0xf   :  { %s911_s28 = smov 0  }
  0x10 LB: > { %1122 = sst [smem:[#allocation14_spill]] %s817_s18  ;;  %s510_s29 = sadd.s32 4294967295, %s857_s28   ;;  %s857_s28 = sphi %s911_s28, %s25_s28   ;;  %s853_s27 = sphi %s909_s27, %s1148_s27   ;;  %s849_s26 = sphi %s907_s26, %s1155_s26   ;;  %s845_s25 = sphi %s905_s25, %s1146_s25   ;;  %s841_s24 = sphi %s903_s24, %s1154_s24   ;;  %s837_s23 = sphi %s901_s23, %s1153_s23   ;;  %s833_s22 = sphi %s899_s22, %s1152_s22   ;;  %s829_s21 = sphi %s897_s21, %s1151_s21   ;;  %s825_s20 = sphi %s895_s20, %s1150_s20   ;;  %s821_s19 = sphi %s893_s19, %s1149_s19   ;;  %s817_s18 = sphi %s891_s18, %s1145_s18  }
  0x11   : > { %1123 = sst [smem:[#allocation15_spill]] %s821_s19  ;;  %s511_s30 = sadd.s32 4294967294, %s857_s28  }
  0x12   : > { %1124 = sst [smem:[#allocation16_spill]] %s841_s24  ;;  %p80_p0 = scmp.ne.s32.totalorder %s833_s22, %s829_s21 }
  0x13   : > { %1125 = sst [smem:[#allocation17_spill]] %s853_s27  ;;  %p947_p1 = scmp.eq.s32.totalorder %s510_s29, 0 }
  0x14   : > { %p173_p2 = scmp.ne.s32.totalorder %s825_s20, %s821_s19  ;;  %p174_p4 = scmp.eq.s32.totalorder %s510_s29, 3 }
  0x15   : > { %p956_p3 = por %p947_p1, %p80_p0  ;;  %p179_p5 = scmp.ne.s32.totalorder %s821_s19, %s817_s18 }
  0x16   : > { %p180_p6 = scmp.eq.s32.totalorder %s511_s30, 3  ;;  %p962_p7 = por %p174_p4, %p173_p2 }
  0x17   : > { %p512_p8 = scmp.ge.s32.totalorder %s857_s28, 1  ;;  %p187_p10 = scmp.lt.s32.totalorder %s857_s28, 5 }
  0x18   : > { %s1128_s9 = scalar_select %p962_p7, 1, 0 }
  0x19   : > { %p967_p9 = por %p180_p6, %p179_p5  ;;  %s1132_s0 = sld [smem:[#allocation22_spill]] }
  0x1a   : > { %1129 = sst [smem:[#allocation18_spill]] %s1128_s9  ;;  %p975_p11 = pnand %p512_p8, %p187_p10 }
  0x1b   : > { %s1130_s10 = scalar_select %p967_p9, 1, 0 }
  0x1c   : > { %p542_p12 = pneg %p975_p11  ;;  %s34_s15 = sadd.s32 1, %s849_s26 }
  0x1d   : > { %1131 = sst [smem:[#allocation19_spill]] %s1130_s10  ;;  %s859_s16 = smov [#allocation2]  }
  0x1e   : > { %p543_p13 = pnand %p542_p12, %p947_p1  ;;  %p35_p0 = scmp.ge.s32.totalorder %s34_s15, 2 }
  0x1f   : > { %s199_s13 = sshll.u32 %s1132_s0, 4  ;;  %s37_s17 = sadd.s32 1, %s853_s27  ;;  %s200_s13 = int_to_ptr.vmem [resolvable:$true] %s199_s13 }
  0x20   : > { %545 = dma.vmem_to_smem (!%p543_p13), %s200_s13, 16, %s859_s16, [#allocation5]  }
  0x21   : > { %s67_s21 = sadd.s32 1, %s837_s23  ;;  %p74_p2 = scmp.ne.s32.totalorder %s837_s23, %s833_s22 }
  0x22   : > { %s1157_s15 = smov (%p35_p0, %s34_s15), 0  ;;  %s1159_s17 = smov (!%p35_p0, %s37_s17), %s853_s27 }
  0x23   : > { %1134 = sst [smem:[#allocation20_spill]] %s1157_s15  ;;  %s63_s29 = ssub.s32 %s849_s26, %s1157_s15 }
  0x24   : > { %p75_p4 = scmp.eq.s32.totalorder %s857_s28, 0  ;;  %p39_p5 = scmp.ge.s32.totalorder %s1159_s17, 2 }
  0x25   : > { %p558_p6 = scmp.lt.s32.totalorder %s857_s28, 4  ;;  %s1000_s11 = sand.u32 1, %s837_s23  }
  0x26   : > { %p995_p8 = por %p75_p4, %p74_p2  ;;  %s1161_s17 = smov (%p39_p5, %s1159_s17), 0 }
  0x27   : > { %1136 = sst [smem:[#allocation21_spill]] %s1161_s17  ;;  %s515_s12 = sshll.u32 %s1000_s11, 2 }
  0x28   : > { %s62_s13 = ssub.s32 %s853_s27, %s1161_s17  ;;  %s516_s7 = sshll.u32 %s853_s27, 1 }
  0x29   : > { %s64_s16 = sor.u32 %s63_s29, %s62_s13  ;;  %p161_p10 = scmp.eq.s32.totalorder %s62_s13, 0 }
  0x2a   : > { %p65_p12 = scmp.eq.s32.totalorder %s64_s16, 0  ;;  %s1137_s0 = sadd.s32 1, %s825_s20 }
  0x2b   : > { %s1011_s15 = scalar_select %p161_p10, %s825_s20, %s1137_s0  }
  0x2c   : > { %s1014_s10 = scalar_select %p65_p12, %s837_s23, %s67_s21  }
  0x2d   : > { %s224_s18 = sadd.s32 %s849_s26, %s516_s7  ;;  %s220_s9 = scalar_lea.vmem [#allocation6], %s515_s12 }
  0x2e   : > { %s230_s5 = sshll.u32 %s220_s9, 4  ;;  %s517_s24 = sshll.u32 %s224_s18, 2  ;;  %s231_s5 = int_to_ptr.vmem [resolvable:$true] %s230_s5 }
  0x2f   : > { %s226_s17 = scalar_lea.hbm %s1105_s1, %s517_s24  ;;  %p547_p13 = pnand %p558_p6, %p995_p8 }
  0x30   : > { %s228_s29 = sshll.u32 %s226_s17, 4  ;;  %s217_s13 = scalar_lea.sflag [#allocation3], %s1000_s11  ;;  %s229_s29 = int_to_ptr.hbm [resolvable:$true] %s228_s29 }
  0x31   : > { %549 = dma.hbm_to_vmem [thread:$0]  (!%p547_p13), %s229_s29, 64, %s231_s5, %s217_s13  }
  0x32   : > { %s247_s7 = scalar_lea.hbm %s1106_s2, %s517_s24  ;;  %s241_s27 = scalar_lea.vmem [#allocation7], %s515_s12 }
  0x33   : > { %s249_s16 = sshll.u32 %s247_s7, 4  ;;  %s251_s9 = sshll.u32 %s241_s27, 4  ;;  %s250_s16 = int_to_ptr.hbm [resolvable:$true] %s249_s16  ;;  %s252_s9 = int_to_ptr.vmem [resolvable:$true] %s251_s9 }
  0x34   : > { %s238_s18 = scalar_lea.sflag [#allocation8], %s1000_s11  ;;  %260 = sbr.rel (%p975_p11) target bundleno = 228 (0xe4), region = 40 }
  0x35   : > { %552 = dma.hbm_to_vmem [thread:$0]  (!%p547_p13), %s250_s16, 64, %s252_s9, %s238_s18  }
  0x39   : > { %800 = dma.done.wait (%p947_p1), [#allocation5], 16  }
  0x3a   : > { %802 = vsyncadd (%p947_p1), [#allocation5], 4294967280  ;;  %s267_s3 = sand.u32 1, %s833_s22  }
  0x3b   : > { %s523_s5 = sshll.u32 %s267_s3, 2  ;;  %s268_s19 = scalar_lea.sflag [#allocation3], %s267_s3 }
  0x3c   : > { %s271_s24 = scalar_lea.vmem [#allocation6], %s523_s5 }
  0x3d   : > { %804 = dma.done.wait (%p956_p3), %s268_s19, 64  }
  0x3e   : > { %806 = vsyncadd (%p956_p3), %s268_s19, 4294967232  ;;  %s278_s27 = scalar_lea.sflag [#allocation8], %s267_s3  ;;  %s281_s14 = scalar_lea.vmem [#allocation7], %s523_s5 }
  0x3f   : > { %808 = dma.done.wait (%p956_p3), %s278_s27, 64  }
  0x40   : > { %810 = vsyncadd (%p956_p3), %s278_s27, 4294967232 }
  0x41   : > { %287 = sfence }
  0x42   : > { %s315_s6 = sld [smem:[#allocation2 + %s845_s25]]  ;;  %v328_v0 = vld [vmem:[%s1108_s4] sm:$0xf]  ;;  %v860_v1 = vmov 0   ;;  %v318_v2 = vld [vmem:[%s281_s14] sm:$0xf] }
  0x43   : > { %651 = vset.pattern.permute.xlu0 %v860_v1  ;;  %v317_v3 = vld [vmem:[%s271_s24] sm:$0xf]  ;;  %s1138_s12 = sld [smem:[#allocation15_spill]]  ;;  %vm338_vm0 = vcmask 1043456   ;;  %vm334_vm1 = vcmask 31744   ;;  %s529_s16 = sshll.u32 %s845_s25, 1 }
  0x44   : > { %331 = vperm.xlu0 %651, %v328_v0   ;;  %s1139_s13 = sld [smem:[#allocation23_spill]] }
  0x45   : > { %s1140_s0 = sld [smem:[#allocation16_spill]] }
  0x46   : > { %s1141_s3 = sld [smem:[#allocation24_spill]] }
  0x48   : > { %s316_s11 = ssub.f32 1.0, %s315_s6  ;;  %v321_v4 = vstv %s315_s6 }
  0x49   : > { %v322_v5 = vmul.f32 %v321_v4, %v318_v2  ;;  %v325_v6 = vmul.f32 %v321_v4, %v317_v3  ;;  %s312_s21 = sand.u32 1, %s1138_s12  }
  0x4a   : > { %v319_v7 = vstv %s316_s11  ;;  %v327_v11 = vld [vmem:[%s1139_s13] sm:$0xf]  ;;  %s525_s7 = sshll.u32 %s312_s21, 1  ;;  %s374_s17 = scalar_lea.sflag [#allocation4], %s312_s21 }
  0x4b   : > { %v320_v8 = vmul.f32 %v319_v7, %v317_v3  ;;  %v324_v9 = vmul.f32 %v319_v7, %v318_v2  ;;  %s314_s24 = scalar_lea.vmem [#allocation9], %s525_s7 }
  0x4c   : > { %s384_s5 = scalar_lea.hbm %s1141_s3, %s529_s16  ;;  %s386_s27 = sshll.u32 %s314_s24, 4  ;;  %s387_s27 = int_to_ptr.vmem [resolvable:$true] %s386_s27 }
  0x4d   : > { %v323_v10 = vadd.f32 %v322_v5, %v320_v8  ;;  %v326_v12 = vsub.f32 %v324_v9, %v325_v6  ;;  %s388_s14 = sshll.u32 %s384_s5, 4  ;;  %s371_s6 = scalar_lea.vmem %s314_s24, %s1140_s0 [#allocation9]  ;;  %s389_s14 = int_to_ptr.hbm [resolvable:$true] %s388_s14 }
  0x4e   : > { %s741_s30 = sshra.s32 %s389_s14, 4  ;;  %s747_s8 = scalar_lea.hbm %s1141_s3, 4  ;;  %s742_s30 = int_to_ptr.hbm [resolvable:$true] %s741_s30 }
  0x4f   : > { %526 = vmatpush.msk.msra.mxu0 %vm338_vm0, %v323_v10  ;;  %s743_s25 = scalar_lea.hbm %s742_s30, 2  ;;  %p748_p0 = scmp.lt.s32.totalorder %s742_s30, %s1141_s3 }
  0x50   : > { %527 = vmatmul.msk.f32.vlgmr.msra.gmra.mxu0 %vm334_vm1, %v327_v11  ;;  %p744_p1 = scmp.ne.s32.totalorder %s742_s30, %s743_s25  ;;  %p749_p2 = scmp.lt.s32.totalorder %s747_s8, %s743_s25 }
  0x52   : > { %p745_p3 = pnand %p744_p1, %p962_p7  ;;  %p750_p4 = por %p749_p2, %p748_p0 }
  0x54   : > { %p746_p11 = pneg %p745_p3 }
  0x56   : > { %p751_p5 = pnand %p750_p4, %p746_p11 }
  0xb6   : > { %v332_v13 = vpop.permute.xlu0 %331 }
  0xcd   : > { %v359_v14 = vpop.f32.mrf.mxu0 }
  0xce   : > { %v360_v15 = vadd.f32 %v359_v14, %v332_v13 }
  0xd0   : > { %v362_v16 = vsub.f32 %v326_v12, %v360_v15 }
  0xd2   : > { %v363_v17 = vmul.f32 %v362_v16, %v362_v16 }
  0xd4   : > { %v364_v18 = vsel %vm338_vm0, %v363_v17, 0.0 }
  0xd5   : > { %v365_v19 = vrot.slane %v364_v18, 4 }
  0xd7   : > { %v366_v20 = vadd.f32 %v365_v19, %v364_v18 }
  0xd9   : > { %v367_v21 = vrot.slane %v366_v20, 2 }
  0xdb   : > { %v368_v22 = vadd.f32 %v367_v21, %v366_v20 }
  0xdd   : > { %v369_v23 = vrot.slane %v368_v22, 1 }
  0xdf   : > { %v370_v24 = vadd.f32 %v369_v23, %v368_v22 }
  0xe1   : > { %372 = vst [vmem:[%s371_s6] sm:$0x1] %v370_v24 }
  0xe2   : > { %754 = shalt.err (!%p751_p5)
}
  0xe3   : > { %540 = dma.vmem_to_hbm [thread:$0]  (%p962_p7), %s387_s27, 32, %s389_s14, %s374_s17  }
  0xe4 PF: > { %s1143_s0 = sld [smem:[#allocation14_spill]]  ;;  %p560_p6 = scmp.ge.s32.totalorder %s857_s28, 2 }
  0xe6   : > { %p554_p8 = pnand %p560_p6, %p967_p9 }
  0xe8   : > { %p555_p10 = pneg %p554_p8 }
  0xea   : > { %s400_s7 = sand.u32 1, %s1143_s0  }
  0xeb   : > { %s401_s16 = scalar_lea.sflag [#allocation4], %s400_s7 }
  0xec   : > { %812 = dma.done.wait (%p555_p10), %s401_s16, 32  }
  0xed   : > { %814 = vsyncadd (%p555_p10), %s401_s16, 4294967264  ;;  %s25_s28 = sadd.s32 1, %s857_s28   ;;  %s1145_s18 = sld [smem:[#allocation15_spill]] }
  0xee   : > { %p22_p12 = scmp.ge.s32.totalorder %s25_s28, 6   ;;  %s1146_s25 = sld [smem:[#allocation17_spill]] }
  0xef   : > { %s1147_s9 = sld [smem:[#allocation20_spill]]  ;;  %s1149_s19 = smov %s825_s20 }
  0xf0   : > { %s1148_s27 = sld [smem:[#allocation21_spill]]  ;;  %s1150_s20 = smov %s1011_s15 }
  0xf1   : > { %s1151_s21 = smov %s833_s22  ;;  %s1152_s22 = smov %s837_s23 }
  0xf2   : > { %s1153_s23 = smov %s1014_s10  ;;  %s1154_s24 = smov %s849_s26 }
  0xf3   :  { %24 = sbr.rel (!%p22_p12) target bundleno = 16 (0x10), region = 104 }
  0xf5   : > { %s1155_s26 = smov %s1147_s9 }
  0xf8   :  { %407 = vsyncpa [#allocation3], 1 }
  0xf9   :  { %409 = vsyncpa [#allocation3 + $0x1], 1 }
  0xfa   :  { %410 = vsyncpa [#allocation8], 1 }
  0xfb   :  { %412 = vsyncpa [#allocation8 + $0x1], 1 }
  0xfc   :  { %413 = vsyncpa [#allocation4], 1 }
  0xfd   :  { %415 = vsyncpa [#allocation4 + $0x1], 1 }
  0xfe   :  { %416 = vsyncpa [#allocation5], 1 }
  0xff   :  { %418 = vsyncpa [#allocation5 + $0x1], 1 }

</bundles_post_ra>
